<compile_context>
chip_gen: v7x
topology: tpu7x:2x2x1
jax: 0.10.0
libtpu: 0.0.40
codegen_flags: <defaults>
</compile_context>

<pallas_src>
import numpy as np
import jax
import jax.numpy as jnp
from jax import lax
from jax.experimental import pallas as pl
from jax.experimental.pallas import tpu as pltpu

_SUB = 8      # sublane granularity: batch stores into aligned (8, 128k) tiles
_LANE = 128   # lane width: pad reservoir size to a multiple of this


def _round_up(x, m):
    return ((x + m - 1) // m) * m


def esn_states_kernel(x_ref, w_in_ref, w_res_t_ref, states_ref, state_sc):
    """One time-block of the echo-state recurrence.

    x_ref       : VMEM (T_BLK, 1)      scaled input drive (row 0 pre-zeroed)
    w_in_ref    : VMEM (1, R_pad)      input weights (row form, zero padded)
    w_res_t_ref : VMEM (R_pad, R_pad)  normalized reservoir, transposed, zero padded
    states_ref  : VMEM (T_BLK, R_pad)  reservoir states for this time block
    state_sc    : VMEM (1, R_pad)      recurrent state carried across grid steps
    """
    T_BLK = states_ref.shape[0]
    R_pad = states_ref.shape[1]
    n_sub = T_BLK // _SUB

    @pl.when(pl.program_id(0) == 0)
    def _():
        state_sc[...] = jnp.zeros_like(state_sc)

    # Hoist loop-invariant weights out of the recurrence.
    w_in = w_in_ref[...]                                  # (1, R_pad)
    hoist_w_res = R_pad <= _LANE                          # 16 vregs -> keep in regs
    w_res_t_val = w_res_t_ref[...] if hoist_w_res else None

    def sub_block(sb, state):
        base = sb * _SUB
        if not isinstance(base, int):
            base = pl.multiple_of(base, _SUB)             # aligned dynamic slice
        x_blk = x_ref[pl.ds(base, _SUB), :]               # (8, 1)
        inp_blk = x_blk * w_in                            # (8, R_pad) input drive
        rhs = w_res_t_val if hoist_w_res else w_res_t_ref[...]
        rows = []
        for j in range(_SUB):                             # unrolled serial recurrence
            rec = jnp.dot(state, rhs, preferred_element_type=jnp.float32)
            state = jnp.tanh(inp_blk[j:j + 1, :] + rec)   # (1, R_pad)
            rows.append(state)
        # One aligned (8, R_pad) lane-dense store instead of 8 masked row stores.
        states_ref[pl.ds(base, _SUB), :] = jnp.concatenate(rows, axis=0)
        return state

    state = state_sc[...]                                 # state lives in vregs below
    if n_sub == 1:
        state = sub_block(0, state)
    else:
        state = lax.fori_loop(0, n_sub, sub_block, state)
    state_sc[...] = state                                 # carry to next grid step


def echo_state_forward(W_res, X, W_in, input_scaling=1.0, time_block=None):
    """Pallas equivalent of EchoStateNetwork.forward(W_res, X).

    Returns combined_states = concat([states, X_scaled], axis=1), shape (T, R+1).
    """
    T = X.shape[0]
    R = W_res.shape[0]

    X_scaled = jnp.asarray(X, jnp.float32).reshape(T, 1) * input_scaling   # (T, 1)

    # Spectral-radius normalization: nonsymmetric eigvals has no TPU/Pallas
    # path, so this glue runs on the host in float64 (matching torch).
    W_res64 = np.asarray(W_res, dtype=np.float64)
    spectral_radius = float(np.max(np.abs(np.linalg.eigvals(W_res64))))
    W_res_norm = (W_res64 / spectral_radius).astype(np.float32)

    # Pad the reservoir to the lane width; zero padding keeps the extra lanes
    # exactly zero through the recurrence (tanh(0) == 0), so they are inert.
    R_pad = _round_up(max(R, _LANE), _LANE)
    if time_block is None:
        time_block = min(256, _round_up(T, _SUB))
    T_blk = _round_up(time_block, _SUB)
    T_pad = _round_up(max(T, T_blk), T_blk)
    num_blocks = T_pad // T_blk

    # Input drive for the recurrence.  Zeroing row 0 makes the recurrence
    # uniform: tanh(W_in*0 + W_res@0) == 0 reproduces states[0] = 0 exactly.
    x_drive = jnp.zeros((T_pad, 1), jnp.float32).at[:T].set(X_scaled).at[0, 0].set(0.0)

    w_in_row = (jnp.zeros((1, R_pad), jnp.float32)
                .at[0, :R].set(jnp.asarray(W_in, jnp.float32).reshape(R)))
    w_res_t = (jnp.zeros((R_pad, R_pad), jnp.float32)
               .at[:R, :R].set(jnp.asarray(W_res_norm.T)))

    states_pad = pl.pallas_call(
        esn_states_kernel,
        out_shape=jax.ShapeDtypeStruct((T_pad, R_pad), jnp.float32),
        grid_spec=pltpu.PrefetchScalarGridSpec(
            num_scalar_prefetch=0,
            grid=(num_blocks,),
            in_specs=[
                pl.BlockSpec((T_blk, 1), lambda i: (i, 0)),        # X drive
                pl.BlockSpec((1, R_pad), lambda i: (0, 0)),        # W_in row
                pl.BlockSpec((R_pad, R_pad), lambda i: (0, 0)),    # W_res^T
            ],
            out_specs=pl.BlockSpec((T_blk, R_pad), lambda i: (i, 0)),
            scratch_shapes=[pltpu.VMEM((1, R_pad), jnp.float32)],  # carried state
        ),
        compiler_params=pltpu.CompilerParams(
            dimension_semantics=("arbitrary",),   # serial in time (state carry)
        ),
    )(x_drive, w_in_row, w_res_t)

    states = states_pad[:T, :R]                                    # drop padding
    combined_states = jnp.concatenate([states, X_scaled], axis=1)  # (T, R+1)
    return combined_states


def reference_forward(W_res, X, W_in, input_scaling=1.0):
    """Pure numpy (f64) reference of the PyTorch forward."""
    X_scaled = np.asarray(X, dtype=np.float64) * input_scaling
    W_res64 = np.asarray(W_res, dtype=np.float64)
    rho = np.max(np.abs(np.linalg.eigvals(W_res64)))
    Wr = W_res64 / rho
    Wi = np.asarray(W_in, dtype=np.float64)
    T = X_scaled.shape[0]
    R = Wr.shape[0]
    states = np.zeros((T, R), dtype=np.float64)
    for t in range(1, T):
        states[t] = np.tanh(Wi @ X_scaled[t] + Wr @ states[t - 1])
    return np.concatenate([states, X_scaled], axis=1)


if __name__ == "__main__":
    T = 16    # sequence length
    R = 35    # reservoir size (module default reservoir_size=35)

    key = jax.random.PRNGKey(0)
    k_win, k_wres, k_x = jax.random.split(key, 3)

    # Deterministic "parameters" / inputs, matching the module's init shapes.
    W_in = jax.random.uniform(k_win, (R, 1), jnp.float32, -1.0, 1.0)   # like torch.rand*2-1
    W_res = jax.random.uniform(k_wres, (R, R), jnp.float32, -0.5, 0.5)
    X = jax.random.normal(k_x, (T, 1), jnp.float32)

    ref = reference_forward(np.asarray(W_res), np.asarray(X), np.asarray(W_in))

    # Single time-block (inner fori_loop over 8-step sub-blocks).
    out1 = jax.block_until_ready(echo_state_forward(W_res, X, W_in, input_scaling=1.0))
    # Multiple grid steps over time (state carried across grid via VMEM scratch).
    out2 = jax.block_until_ready(
        echo_state_forward(W_res, X, W_in, input_scaling=1.0, time_block=8))

    for out in (out1, out2):
        assert out.shape == (T, R + 1), out.shape
        # f32 recurrence vs f64 reference -> allow small precision drift.
        assert np.allclose(np.asarray(out, np.float64), ref, atol=1e-3, rtol=1e-3), \
            "Pallas ESN output mismatch vs reference"

    print("KERNEL_OK")
</pallas_src>

<mosaic_0001>
module attributes {stable_mosaic.version = 11 : i64} {
  func.func @esn_states_kernel(%arg0: i32, %arg1: memref<16x1xf32, #tpu.memory_space<vmem>>, %arg2: memref<1x128xf32, #tpu.memory_space<vmem>>, %arg3: memref<128x128xf32, #tpu.memory_space<vmem>>, %arg4: memref<16x128xf32, #tpu.memory_space<vmem>>, %arg5: memref<1x128xf32, #tpu.memory_space<vmem>>) attributes {dimension_semantics = [#tpu.dimension_semantics<arbitrary>], iteration_bounds = array<i64: 1>, scalar_prefetch = 0 : i64, scratch_operands = 1 : i64, tpu.core_type = #tpu.core_type<tc>, window_params = [{transform_indices = @transform_0, window_bounds = array<i64: 16, 1>}, {pipeline_mode = #tpu.pipeline_mode<synchronous>, transform_indices = @transform_1, window_bounds = array<i64: 1, 128>}, {pipeline_mode = #tpu.pipeline_mode<synchronous>, transform_indices = @transform_2, window_bounds = array<i64: 128, 128>}, {transform_indices = @transform_3, window_bounds = array<i64: 16, 128>}]} {
    %c0_i32 = arith.constant 0 : i32
    %0 = arith.cmpi eq, %arg0, %c0_i32 : i32
    %1 = arith.extui %0 : i1 to i32
    %c0_i32_0 = arith.constant 0 : i32
    %2 = arith.cmpi ne, %1, %c0_i32_0 : i32
    scf.if %2 {
      %cst = arith.constant 0.000000e+00 : f32
      %9 = vector.broadcast %cst : f32 to vector<1x128xf32>
      %c0_10 = arith.constant 0 : index
      %c0_11 = arith.constant 0 : index
      %10 = vector.load %arg5[%c0_10, %c0_11] : memref<1x128xf32, #tpu.memory_space<vmem>>, vector<1x128xf32>
      tpu.vector_store %arg5[%c0_10, %c0_11], %9 {strides = array<i32>} : memref<1x128xf32, #tpu.memory_space<vmem>>, vector<1x128xf32>,
    } else {
    }
    %c0 = arith.constant 0 : index
    %c0_1 = arith.constant 0 : index
    %3 = vector.load %arg2[%c0, %c0_1] : memref<1x128xf32, #tpu.memory_space<vmem>>, vector<1x128xf32>
    %c0_2 = arith.constant 0 : index
    %c0_3 = arith.constant 0 : index
    %4 = vector.load %arg3[%c0_2, %c0_3] : memref<128x128xf32, #tpu.memory_space<vmem>>, vector<128x128xf32>
    %c0_4 = arith.constant 0 : index
    %c0_5 = arith.constant 0 : index
    %5 = vector.load %arg5[%c0_4, %c0_5] : memref<1x128xf32, #tpu.memory_space<vmem>>, vector<1x128xf32>
    %c0_i32_6 = arith.constant 0 : i32
    %c2_i32 = arith.constant 2 : i32
    %6 = arith.addi %c0_i32_6, %c2_i32 : i32
    %c1_i32 = arith.constant 1 : i32
    %7 = scf.for %arg6 = %c0_i32_6 to %6 step %c1_i32 iter_args(%arg7 = %5) -> (vector<1x128xf32>)  : i32 {
      %c8_i32 = arith.constant 8 : i32
      %9 = arith.muli %arg6, %c8_i32 : i32
      %10 = tpu.assume_multiple %9, 8 : i32
      %11 = arith.index_cast %10 : i32 to index
      %c0_10 = arith.constant 0 : index
      %12 = vector.load %arg1[%11, %c0_10] : memref<16x1xf32, #tpu.memory_space<vmem>>, vector<8x1xf32>
      %13 = vector.broadcast %12 : vector<8x1xf32> to vector<8x128xf32>
      %14 = vector.broadcast %3 : vector<1x128xf32> to vector<8x128xf32>
      %15 = arith.mulf %13, %14 : vector<8x128xf32>
      %cst = arith.constant dense<0.000000e+00> : vector<1x128xf32>
      %16 = tpu.matmul %arg7, %4, %cst {dimension_numbers = #tpu.dot_dimension_numbers<[1], [0], [0], [1], [0, 0, 1, 1], [], []>} : vector<1x128xf32>, vector<128x128xf32>, vector<1x128xf32> -> vector<1x128xf32>
      %17 = vector.extract_strided_slice %15 {offsets = [0, 0], sizes = [1, 128], strides = [1, 1]} : vector<8x128xf32> to vector<1x128xf32>
      %18 = arith.addf %17, %16 : vector<1x128xf32>
      %19 = math.tanh %18 : vector<1x128xf32>
      %cst_11 = arith.constant dense<0.000000e+00> : vector<1x128xf32>
      %20 = tpu.matmul %19, %4, %cst_11 {dimension_numbers = #tpu.dot_dimension_numbers<[1], [0], [0], [1], [0, 0, 1, 1], [], []>} : vector<1x128xf32>, vector<128x128xf32>, vector<1x128xf32> -> vector<1x128xf32>
      %21 = vector.extract_strided_slice %15 {offsets = [1, 0], sizes = [1, 128], strides = [1, 1]} : vector<8x128xf32> to vector<1x128xf32>
      %22 = arith.addf %21, %20 : vector<1x128xf32>
      %23 = math.tanh %22 : vector<1x128xf32>
      %cst_12 = arith.constant dense<0.000000e+00> : vector<1x128xf32>
      %24 = tpu.matmul %23, %4, %cst_12 {dimension_numbers = #tpu.dot_dimension_numbers<[1], [0], [0], [1], [0, 0, 1, 1], [], []>} : vector<1x128xf32>, vector<128x128xf32>, vector<1x128xf32> -> vector<1x128xf32>
      %25 = vector.extract_strided_slice %15 {offsets = [2, 0], sizes = [1, 128], strides = [1, 1]} : vector<8x128xf32> to vector<1x128xf32>
      %26 = arith.addf %25, %24 : vector<1x128xf32>
      %27 = math.tanh %26 : vector<1x128xf32>
      %cst_13 = arith.constant dense<0.000000e+00> : vector<1x128xf32>
      %28 = tpu.matmul %27, %4, %cst_13 {dimension_numbers = #tpu.dot_dimension_numbers<[1], [0], [0], [1], [0, 0, 1, 1], [], []>} : vector<1x128xf32>, vector<128x128xf32>, vector<1x128xf32> -> vector<1x128xf32>
      %29 = vector.extract_strided_slice %15 {offsets = [3, 0], sizes = [1, 128], strides = [1, 1]} : vector<8x128xf32> to vector<1x128xf32>
      %30 = arith.addf %29, %28 : vector<1x128xf32>
      %31 = math.tanh %30 : vector<1x128xf32>
      %cst_14 = arith.constant dense<0.000000e+00> : vector<1x128xf32>
      %32 = tpu.matmul %31, %4, %cst_14 {dimension_numbers = #tpu.dot_dimension_numbers<[1], [0], [0], [1], [0, 0, 1, 1], [], []>} : vector<1x128xf32>, vector<128x128xf32>, vector<1x128xf32> -> vector<1x128xf32>
      %33 = vector.extract_strided_slice %15 {offsets = [4, 0], sizes = [1, 128], strides = [1, 1]} : vector<8x128xf32> to vector<1x128xf32>
      %34 = arith.addf %33, %32 : vector<1x128xf32>
      %35 = math.tanh %34 : vector<1x128xf32>
      %cst_15 = arith.constant dense<0.000000e+00> : vector<1x128xf32>
      %36 = tpu.matmul %35, %4, %cst_15 {dimension_numbers = #tpu.dot_dimension_numbers<[1], [0], [0], [1], [0, 0, 1, 1], [], []>} : vector<1x128xf32>, vector<128x128xf32>, vector<1x128xf32> -> vector<1x128xf32>
      %37 = vector.extract_strided_slice %15 {offsets = [5, 0], sizes = [1, 128], strides = [1, 1]} : vector<8x128xf32> to vector<1x128xf32>
      %38 = arith.addf %37, %36 : vector<1x128xf32>
      %39 = math.tanh %38 : vector<1x128xf32>
      %cst_16 = arith.constant dense<0.000000e+00> : vector<1x128xf32>
      %40 = tpu.matmul %39, %4, %cst_16 {dimension_numbers = #tpu.dot_dimension_numbers<[1], [0], [0], [1], [0, 0, 1, 1], [], []>} : vector<1x128xf32>, vector<128x128xf32>, vector<1x128xf32> -> vector<1x128xf32>
      %41 = vector.extract_strided_slice %15 {offsets = [6, 0], sizes = [1, 128], strides = [1, 1]} : vector<8x128xf32> to vector<1x128xf32>
      %42 = arith.addf %41, %40 : vector<1x128xf32>
      %43 = math.tanh %42 : vector<1x128xf32>
      %cst_17 = arith.constant dense<0.000000e+00> : vector<1x128xf32>
      %44 = tpu.matmul %43, %4, %cst_17 {dimension_numbers = #tpu.dot_dimension_numbers<[1], [0], [0], [1], [0, 0, 1, 1], [], []>} : vector<1x128xf32>, vector<128x128xf32>, vector<1x128xf32> -> vector<1x128xf32>
      %45 = vector.extract_strided_slice %15 {offsets = [7, 0], sizes = [1, 128], strides = [1, 1]} : vector<8x128xf32> to vector<1x128xf32>
      %46 = arith.addf %45, %44 : vector<1x128xf32>
      %47 = math.tanh %46 : vector<1x128xf32>
      %48 = tpu.concatenate %19, %23, %27, %31, %35, %39, %43, %47 in 0 : vector<1x128xf32>, vector<1x128xf32>, vector<1x128xf32>, vector<1x128xf32>, vector<1x128xf32>, vector<1x128xf32>, vector<1x128xf32>, vector<1x128xf32> -> vector<8x128xf32>
      %49 = arith.index_cast %10 : i32 to index
      %c0_18 = arith.constant 0 : index
      %50 = vector.load %arg4[%49, %c0_18] : memref<16x128xf32, #tpu.memory_space<vmem>>, vector<8x128xf32>
      tpu.vector_store %arg4[%49, %c0_18], %48 {strides = array<i32>} : memref<16x128xf32, #tpu.memory_space<vmem>>, vector<8x128xf32>,
      scf.yield %47 : vector<1x128xf32>
    }
    %c2_i32_7 = arith.constant 2 : i32
    %c0_8 = arith.constant 0 : index
    %c0_9 = arith.constant 0 : index
    %8 = vector.load %arg5[%c0_8, %c0_9] : memref<1x128xf32, #tpu.memory_space<vmem>>, vector<1x128xf32>
    tpu.vector_store %arg5[%c0_8, %c0_9], %7 {strides = array<i32>} : memref<1x128xf32, #tpu.memory_space<vmem>>, vector<1x128xf32>,
    return
  }
  func.func @transform_0(%arg0: i32) -> (i32, i32) {
    %c0_i32 = arith.constant 0 : i32
    %c0_i32_0 = arith.constant 0 : i32
    return %arg0, %c0_i32 : i32, i32
  }
  func.func @transform_1(%arg0: i32) -> (i32, i32) {
    %c0_i32 = arith.constant 0 : i32
    %c0_i32_0 = arith.constant 0 : i32
    %c0_i32_1 = arith.constant 0 : i32
    return %c0_i32, %c0_i32_0 : i32, i32
  }
  func.func @transform_2(%arg0: i32) -> (i32, i32) {
    %c0_i32 = arith.constant 0 : i32
    %c0_i32_0 = arith.constant 0 : i32
    %c0_i32_1 = arith.constant 0 : i32
    return %c0_i32, %c0_i32_0 : i32, i32
  }
  func.func @transform_3(%arg0: i32) -> (i32, i32) {
    %c0_i32 = arith.constant 0 : i32
    %c0_i32_0 = arith.constant 0 : i32
    return %arg0, %c0_i32 : i32, i32
  }
}

</mosaic_0001>

<bundles_post_ra>
// kernel: tpu_custom_call.1
= control target key start
LH: loop header
LB: loop body
LE: loop exit
PB: predicated region body
PF: predicated region fallthrough
CT: control target
= control target key end

     0   :  { %8 = vsyncpa [#allocation4], 0  ;;  %s1758_s0 = inlined_call_operand.vmem [shape: f32[16,1], index: 0, kind: input, shape index: {}]   ;;  %s1759_s1 = inlined_call_operand.vmem [shape: f32[1,128], index: 1, kind: input, shape index: {}]   ;;  %s1760_s2 = inlined_call_operand.hbm [shape: f32[128,128], index: 2, kind: input, shape index: {}]   ;;  %s1761_s3 = inlined_call_operand.hbm [shape: f32[16,128], index: 3, kind: output, shape index: {}]  }
   0x1   :  { %9 = vsyncpa [#allocation5], 0  ;;  %s1454_s12 = smov [#allocation3]   ;;  %s1390_s16 = scalar_lea.hbm %s1760_s2, 2048 }
   0x2   :  { %s19_s13 = sshll.u32 %s1454_s12, 4  ;;  %p1391_p0 = scmp.ne.s32.totalorder %s1760_s2, %s1390_s16  ;;  %s20_s13 = int_to_ptr.vmem [resolvable:$true] %s19_s13 }
   0x3   :  { %p1394_p1 = scmp.lt.u32.totalorder %s1390_s16, %s1760_s2 }
   0x5   :  { %p1396_p2 = pnand %p1394_p1, %p1391_p0 }
   0x7   :  { %1399 = shalt.err (!%p1396_p2)
}
   0x8   :  { %s1400_s21 = scalar_lea.vmem %s20_s13, 2048  ;;  %p1405_p4 = scmp.lt.s32.totalorder %s20_s13, %s20_s13 }
   0x9   :  { %p1401_p3 = scmp.ne.s32.totalorder %s20_s13, %s1400_s21  ;;  %p1406_p5 = scmp.lt.s32.totalorder %s1400_s21, %s1400_s21 }
   0xb   :  { %p1407_p6 = por %p1406_p5, %p1405_p4 }
   0xd   :  { %p1408_p7 = pnand %p1407_p6, %p1401_p3 }
   0xf   :  { %1411 = shalt.err (!%p1408_p7)
}
  0x10   :  { %s1455_s22 = smov 128   ;;  %s1456_s23 = smov 8  }
  0x11   :  { %25 = dma.hbm_to_vmem [thread:$0]  %s1760_s2, 2048, %s20_s13, [#allocation4], %s1455_s22, %s1455_s22, %s1456_s23  }
  0x12   :  { %1442 = dma.done.wait [#allocation4], 2048  }
  0x13   :  { %1443 = vsyncadd [#allocation4], 4294965248  ;;  %v1457_v0 = vmov 0.0   ;;  %v1501_v1 = vld [vmem:[%s1759_s1] ss:$0 sm:$0xff]  ;;  %v1505_v3 = vld [vmem:[#allocation3 + $0x8] sm:$0xff] }
  0x14   :  { %33 = vst [vmem:[#allocation2] sm:$0x1] %v1457_v0  ;;  %v1503_v2 = vld [vmem:[#allocation3] sm:$0xff]  ;;  %v1507_v4 = vld [vmem:[#allocation3 + $0x10] sm:$0xff]  ;;  %v1509_v5 = vld [vmem:[#allocation3 + $0x18] sm:$0xff]  ;;  %s1537_s1 = smov 0  }
  0x15   :  { %v1511_v6 = vld [vmem:[#allocation3 + $0x20] sm:$0xff]  ;;  %v1513_v7 = vld [vmem:[#allocation3 + $0x28] sm:$0xff]  ;;  %v1515_v8 = vld [vmem:[#allocation3 + $0x30] sm:$0xff] }
  0x16   :  { %v1517_v9 = vld [vmem:[#allocation3 + $0x38] sm:$0xff]  ;;  %v1519_v10 = vld [vmem:[#allocation3 + $0x40] sm:$0xff]  ;;  %v1521_v11 = vld [vmem:[#allocation3 + $0x48] sm:$0xff] }
  0x17   :  { %v1523_v12 = vld [vmem:[#allocation3 + $0x50] sm:$0xff]  ;;  %v1525_v13 = vld [vmem:[#allocation3 + $0x58] sm:$0xff]  ;;  %v1527_v14 = vld [vmem:[#allocation3 + $0x60] sm:$0xff] }
  0x18   :  { %v1529_v15 = vld [vmem:[#allocation3 + $0x68] sm:$0xff]  ;;  %v1531_v16 = vld [vmem:[#allocation3 + $0x70] sm:$0xff]  ;;  %v1533_v17 = vld [vmem:[#allocation3 + $0x78] sm:$0xff] }
  0x1b   :  { %v51_v18 = vld [vmem:[#allocation2] sm:$0x1]  }
  0x1c LB: > { %v1545_v19 = vpack.c.bf16 %v1505_v3, %v1503_v2  ;;  %v1458_v20 = vmov 0.0|0.0   ;;  %v1551_v21 = vpack.c.bf16 %v1509_v5, %v1507_v4  ;;  %s738_s2 = sshll.u32 %s1452_s1, 3  ;;  %vm1459_vm0 = vmmov 0   ;;  %s57_s1 = sadd.s32 1, %s1452_s1   ;;  %s1452_s1 = sphi %s1537_s1, %s57_s1   ;;  %v1448_v18 = vphi %v51_v18, %v1762_v18  }
  0x1d   : > { %1156 = vmatprep.subr.bf16.mxu0 %v1458_v20  ;;  %1180 = vmatprep.subr.bf16.mxu1 %v1458_v20  ;;  %v1460_v22 = vmov 0.0   ;;  %s60_s30 = scalar_lea.vmem %s1758_s0, %s738_s2  ;;  %v1461_v23 = vmov 0   ;;  %v1568_v25 = vpack.c.bf16 %v1513_v7, %v1511_v6  ;;  %v1578_v26 = vpack.c.bf16 %v1517_v9, %v1515_v8  ;;  %s703_s4 = scalar_lea.vmem [#allocation6], %s738_s2 }
  0x1e   : > { %1158 = vmatpush3.bf16.msra.mxu0 %v1545_v19  ;;  %908 = vmatprep.mubr.msk.f32.mxu0 %vm1459_vm0, %v1460_v22  ;;  %v61_v24 = vld [vmem:[%s60_s30] sm:$0xff]  ;;  %v1586_v27 = vpack.c.bf16 %v1521_v11, %v1519_v10  ;;  %v1594_v28 = vpack.c.bf16 %v1525_v13, %v1523_v12  ;;  %v1602_v29 = vpack.c.bf16 %v1529_v15, %v1527_v14  ;;  %vm689_vm1 = vcmask 1040384   ;;  %p54_p8 = scmp.ge.s32.totalorder %s57_s1, 2  }
  0x1f   : > { %1159 = vmatprep.subr.bf16.mxu0 %v1458_v20  ;;  %1373 = vset.pattern.permute.xlu0 %v1461_v23  ;;  %v1610_v30 = vpack.c.bf16 %v1533_v17, %v1531_v16  ;;  %vm691_vm2 = vcmask 1041408   ;;  %vm693_vm3 = vcmask 1042432   ;;  %vm695_vm4 = vcmask 1043456   ;;  %s1462_s5 = smov (%p54_p8), [#allocation6]  }
  0x20   : > { %1182 = vmatpush3.bf16.msra.mxu1 %v1545_v19  ;;  %64 = vperm.xlu0 %1373, %v61_v24   ;;  %vm697_vm5 = vcmask 1044480   ;;  %vm699_vm6 = vcmask 1045504   ;;  %vm701_vm7 = vcmask 1046528   ;;  %s714_s6 = sshll.u32 (%p54_p8), %s1462_s5, 4  ;;  %s715_s6 = int_to_ptr.vmem [resolvable:$true] %s714_s6 }
  0x21   : > { %1183 = vmatprep.subr.bf16.mxu1 %v1458_v20  ;;  %943 = vmatprep.mubr.msk.f32.mxu1 %vm1459_vm0, %v1460_v22  ;;  %s1412_s7 = scalar_lea.vmem (%p54_p8), %s715_s6, 256  ;;  %p1417_p10 = scmp.lt.s32.totalorder (%p54_p8), %s715_s6, %s715_s6 }
  0x22   : > { %1161 = vmatpush3.bf16.msra.mxu0 %v1551_v21  ;;  %p1413_p9 = scmp.ne.s32.totalorder (%p54_p8), %s715_s6, %s1412_s7  ;;  %p1418_p11 = scmp.lt.s32.totalorder (%p54_p8), %s1412_s7, %s1412_s7 }
  0x23   : > { %1162 = vmatprep.subr.bf16.mxu0 %v1458_v20 }
  0x24   : > { %1185 = vmatpush3.bf16.msra.mxu1 %v1551_v21  ;;  %p1419_p12 = por (%p54_p8), %p1418_p11, %p1417_p10 }
  0x25   : > { %1186 = vmatprep.subr.bf16.mxu1 %v1458_v20 }
  0x26   : > { %1164 = vmatpush3.bf16.msra.mxu0 %v1568_v25  ;;  %p1420_p13 = pnand (%p54_p8), %p1419_p12, %p1413_p9 }
  0x27   : > { %1165 = vmatprep.subr.bf16.mxu0 %v1458_v20 }
  0x28   : > { %1188 = vmatpush3.bf16.msra.mxu1 %v1568_v25 }
  0x29   : > { %1189 = vmatprep.subr.bf16.mxu1 %v1458_v20 }
  0x2a   : > { %1167 = vmatpush3.bf16.msra.mxu0 %v1578_v26 }
  0x2b   : > { %1168 = vmatprep.subr.bf16.mxu0 %v1458_v20 }
  0x2c   : > { %1191 = vmatpush3.bf16.msra.mxu1 %v1578_v26 }
  0x2d   : > { %1192 = vmatprep.subr.bf16.mxu1 %v1458_v20 }
  0x2e   : > { %1170 = vmatpush3.bf16.msra.mxu0 %v1586_v27 }
  0x2f   : > { %1171 = vmatprep.subr.bf16.mxu0 %v1458_v20 }
  0x30   : > { %1194 = vmatpush3.bf16.msra.mxu1 %v1586_v27 }
  0x31   : > { %1195 = vmatprep.subr.bf16.mxu1 %v1458_v20 }
  0x32   : > { %1173 = vmatpush3.bf16.msra.mxu0 %v1594_v28 }
  0x33   : > { %1174 = vmatprep.subr.bf16.mxu0 %v1458_v20 }
  0x34   : > { %1197 = vmatpush3.bf16.msra.mxu1 %v1594_v28 }
  0x35   : > { %1198 = vmatprep.subr.bf16.mxu1 %v1458_v20 }
  0x36   : > { %1176 = vmatpush3.bf16.msra.mxu0 %v1602_v29 }
  0x37   : > { %1177 = vmatprep.subr.bf16.mxu0 %v1458_v20 }
  0x38   : > { %1200 = vmatpush3.bf16.msra.mxu1 %v1602_v29 }
  0x39   : > { %1201 = vmatprep.subr.bf16.mxu1 %v1458_v20 }
  0x3a   : > { %1179 = vmatpush3.bf16.msra.mxu0 %v1610_v30 }
  0x3b   : > { %1204 = vmatprep.subr.bf16.mxu0 %v1458_v20 }
  0x3c   : > { %1203 = vmatpush3.bf16.msra.mxu1 %v1610_v30 }
  0x3d   : > { %909 = vmatmul.mubr.f32.vlgmr.msra.gmra.mrb[0].mxu0 %v1448_v18  ;;  %1228 = vmatprep.subr.bf16.mxu1 %v1458_v20 }
  0x3e   : > { %1206 = vmatpush3.bf16.msra.mxu0 %v1545_v19  ;;  %978 = vmatprep.mubr.msk.f32.mxu0 %vm1459_vm0, %v1460_v22 }
  0x3f   : > { %1207 = vmatprep.subr.bf16.mxu0 %v1458_v20 }
  0x42   : > { %1209 = vmatpush3.bf16.msra.mxu0 %v1551_v21 }
  0x43   : > { %1210 = vmatprep.subr.bf16.mxu0 %v1458_v20 }
  0x46   : > { %1212 = vmatpush3.bf16.msra.mxu0 %v1568_v25 }
  0x47   : > { %1213 = vmatprep.subr.bf16.mxu0 %v1458_v20 }
  0x4a   : > { %1215 = vmatpush3.bf16.msra.mxu0 %v1578_v26 }
  0x4b   : > { %1216 = vmatprep.subr.bf16.mxu0 %v1458_v20 }
  0x4e   : > { %1218 = vmatpush3.bf16.msra.mxu0 %v1586_v27 }
  0x4f   : > { %1219 = vmatprep.subr.bf16.mxu0 %v1458_v20 }
  0x52   : > { %1221 = vmatpush3.bf16.msra.mxu0 %v1594_v28 }
  0x53   : > { %1222 = vmatprep.subr.bf16.mxu0 %v1458_v20 }
  0x56   : > { %1224 = vmatpush3.bf16.msra.mxu0 %v1602_v29 }
  0x57   : > { %1225 = vmatprep.subr.bf16.mxu0 %v1458_v20 }
  0x5a   : > { %1227 = vmatpush3.bf16.msra.mxu0 %v1610_v30 }
  0x5b   : > { %1252 = vmatprep.subr.bf16.mxu0 %v1458_v20 }
  0x9f   : > { %v65_v31 = vpop.permute.xlu0 %64 }
  0xa0   : > { %v1638_v32 = vmul.f32 %v1501_v1, %v65_v31 }
 0x110   : > { %v140_v33 = vpop.f32.mrb[0].mxu0 }
 0x111   : > { %v144_v34 = vadd.f32 %v140_v33, %v1638_v32  ;;  %v910_v35 = vpop.f32.mrb[1].mxu0 }
 0x113   : > { %1374 = vtanh.f32 %v144_v34 }
 0x11d   : > { %v1375_v36 = vpop.eup %1374 }
 0x11e   : > { %944 = vmatmul.mubr.f32.vlgmr.msra.gmra.mrb[0].mxu1 %v1375_v36 }
 0x11f   : > { %1230 = vmatpush3.bf16.msra.mxu1 %v1545_v19  ;;  %1013 = vmatprep.mubr.msk.f32.mxu1 %vm1459_vm0, %v1460_v22 }
 0x120   : > { %1231 = vmatprep.subr.bf16.mxu1 %v1458_v20 }
 0x123   : > { %1233 = vmatpush3.bf16.msra.mxu1 %v1551_v21 }
 0x124   : > { %1234 = vmatprep.subr.bf16.mxu1 %v1458_v20 }
 0x127   : > { %1236 = vmatpush3.bf16.msra.mxu1 %v1568_v25 }
 0x128   : > { %1237 = vmatprep.subr.bf16.mxu1 %v1458_v20 }
 0x12b   : > { %1239 = vmatpush3.bf16.msra.mxu1 %v1578_v26 }
 0x12c   : > { %1240 = vmatprep.subr.bf16.mxu1 %v1458_v20 }
 0x12f   : > { %1242 = vmatpush3.bf16.msra.mxu1 %v1586_v27 }
 0x130   : > { %1243 = vmatprep.subr.bf16.mxu1 %v1458_v20 }
 0x133   : > { %1245 = vmatpush3.bf16.msra.mxu1 %v1594_v28 }
 0x134   : > { %1246 = vmatprep.subr.bf16.mxu1 %v1458_v20 }
 0x137   : > { %1248 = vmatpush3.bf16.msra.mxu1 %v1602_v29 }
 0x138   : > { %1249 = vmatprep.subr.bf16.mxu1 %v1458_v20 }
 0x13b   : > { %1251 = vmatpush3.bf16.msra.mxu1 %v1610_v30 }
 0x13c   : > { %1276 = vmatprep.subr.bf16.mxu1 %v1458_v20 }
 0x1f1   : > { %v212_v37 = vpop.f32.mrb[0].mxu1 }
 0x1f2   : > { %v217_v38 = vrot.slane %v212_v37, 7  ;;  %v945_v39 = vpop.f32.mrb[1].mxu1 }
 0x1f4   : > { %v219_v40 = vadd.f32 %v217_v38, %v1638_v32 }
 0x1f6   : > { %1376 = vtanh.f32 %v219_v40 }
 0x200   : > { %v1377_v41 = vpop.eup %1376 }
 0x201   : > { %v222_v42 = vrot.slane %v1377_v41, 1  ;;  %v690_v48 = vsel %vm689_vm1, %v1375_v36, %v1377_v41 }
 0x203   : > { %979 = vmatmul.mubr.f32.vlgmr.msra.gmra.mrb[2].mxu0 %v222_v42 }
 0x204   : > { %1254 = vmatpush3.bf16.msra.mxu0 %v1545_v19  ;;  %1048 = vmatprep.mubr.msk.f32.mxu0 %vm1459_vm0, %v1460_v22 }
 0x205   : > { %1255 = vmatprep.subr.bf16.mxu0 %v1458_v20 }
 0x208   : > { %1257 = vmatpush3.bf16.msra.mxu0 %v1551_v21 }
 0x209   : > { %1258 = vmatprep.subr.bf16.mxu0 %v1458_v20 }
 0x20c   : > { %1260 = vmatpush3.bf16.msra.mxu0 %v1568_v25 }
 0x20d   : > { %1261 = vmatprep.subr.bf16.mxu0 %v1458_v20 }
 0x210   : > { %1263 = vmatpush3.bf16.msra.mxu0 %v1578_v26 }
 0x211   : > { %1264 = vmatprep.subr.bf16.mxu0 %v1458_v20 }
 0x214   : > { %1266 = vmatpush3.bf16.msra.mxu0 %v1586_v27 }
 0x215   : > { %1267 = vmatprep.subr.bf16.mxu0 %v1458_v20 }
 0x218   : > { %1269 = vmatpush3.bf16.msra.mxu0 %v1594_v28 }
 0x219   : > { %1270 = vmatprep.subr.bf16.mxu0 %v1458_v20 }
 0x21c   : > { %1272 = vmatpush3.bf16.msra.mxu0 %v1602_v29 }
 0x21d   : > { %1273 = vmatprep.subr.bf16.mxu0 %v1458_v20 }
 0x220   : > { %1275 = vmatpush3.bf16.msra.mxu0 %v1610_v30 }
 0x221   : > { %1300 = vmatprep.subr.bf16.mxu0 %v1458_v20 }
 0x2d6   : > { %v290_v43 = vpop.f32.mrb[2].mxu0 }
 0x2d7   : > { %v295_v44 = vrot.slane %v290_v43, 6  ;;  %v980_v45 = vpop.f32.mrb[3].mxu0 }
 0x2d9   : > { %v297_v46 = vadd.f32 %v295_v44, %v1638_v32 }
 0x2db   : > { %1378 = vtanh.f32 %v297_v46 }
 0x2e5   : > { %v1379_v47 = vpop.eup %1378 }
 0x2e6   : > { %v692_v49 = vsel %vm691_vm2, %v690_v48, %v1379_v47  ;;  %v300_v50 = vrot.slane %v1379_v47, 2 }
 0x2e8   : > { %1014 = vmatmul.mubr.f32.vlgmr.msra.gmra.mrb[2].mxu1 %v300_v50 }
 0x2e9   : > { %1278 = vmatpush3.bf16.msra.mxu1 %v1545_v19  ;;  %1083 = vmatprep.mubr.msk.f32.mxu1 %vm1459_vm0, %v1460_v22 }
 0x2ea   : > { %1279 = vmatprep.subr.bf16.mxu1 %v1458_v20 }
 0x2ed   : > { %1281 = vmatpush3.bf16.msra.mxu1 %v1551_v21 }
 0x2ee   : > { %1282 = vmatprep.subr.bf16.mxu1 %v1458_v20 }
 0x2f1   : > { %1284 = vmatpush3.bf16.msra.mxu1 %v1568_v25 }
 0x2f2   : > { %1285 = vmatprep.subr.bf16.mxu1 %v1458_v20 }
 0x2f5   : > { %1287 = vmatpush3.bf16.msra.mxu1 %v1578_v26 }
 0x2f6   : > { %1288 = vmatprep.subr.bf16.mxu1 %v1458_v20 }
 0x2f9   : > { %1290 = vmatpush3.bf16.msra.mxu1 %v1586_v27 }
 0x2fa   : > { %1291 = vmatprep.subr.bf16.mxu1 %v1458_v20 }
 0x2fd   : > { %1293 = vmatpush3.bf16.msra.mxu1 %v1594_v28 }
 0x2fe   : > { %1294 = vmatprep.subr.bf16.mxu1 %v1458_v20 }
 0x301   : > { %1296 = vmatpush3.bf16.msra.mxu1 %v1602_v29 }
 0x302   : > { %1297 = vmatprep.subr.bf16.mxu1 %v1458_v20 }
 0x305   : > { %1299 = vmatpush3.bf16.msra.mxu1 %v1610_v30 }
 0x306   : > { %1324 = vmatprep.subr.bf16.mxu1 %v1458_v20 }
 0x3bb   : > { %v368_v51 = vpop.f32.mrb[2].mxu1 }
 0x3bc   : > { %v373_v52 = vrot.slane %v368_v51, 5  ;;  %v1015_v53 = vpop.f32.mrb[3].mxu1 }
 0x3be   : > { %v375_v54 = vadd.f32 %v373_v52, %v1638_v32 }
 0x3c0   : > { %1380 = vtanh.f32 %v375_v54 }
 0x3ca   : > { %v1381_v55 = vpop.eup %1380 }
 0x3cb   : > { %v694_v56 = vsel %vm693_vm3, %v692_v49, %v1381_v55  ;;  %v378_v57 = vrot.slane %v1381_v55, 3 }
 0x3cd   : > { %1049 = vmatmul.mubr.f32.vlgmr.msra.gmra.mrb[4].mxu0 %v378_v57 }
 0x3ce   : > { %1302 = vmatpush3.bf16.msra.mxu0 %v1545_v19  ;;  %1118 = vmatprep.mubr.msk.f32.mxu0 %vm1459_vm0, %v1460_v22 }
 0x3cf   : > { %1303 = vmatprep.subr.bf16.mxu0 %v1458_v20 }
 0x3d2   : > { %1305 = vmatpush3.bf16.msra.mxu0 %v1551_v21 }
 0x3d3   : > { %1306 = vmatprep.subr.bf16.mxu0 %v1458_v20 }
 0x3d6   : > { %1308 = vmatpush3.bf16.msra.mxu0 %v1568_v25 }
 0x3d7   : > { %1309 = vmatprep.subr.bf16.mxu0 %v1458_v20 }
 0x3da   : > { %1311 = vmatpush3.bf16.msra.mxu0 %v1578_v26 }
 0x3db   : > { %1312 = vmatprep.subr.bf16.mxu0 %v1458_v20 }
 0x3de   : > { %1314 = vmatpush3.bf16.msra.mxu0 %v1586_v27 }
 0x3df   : > { %1315 = vmatprep.subr.bf16.mxu0 %v1458_v20 }
 0x3e2   : > { %1317 = vmatpush3.bf16.msra.mxu0 %v1594_v28 }
 0x3e3   : > { %1318 = vmatprep.subr.bf16.mxu0 %v1458_v20 }
 0x3e6   : > { %1320 = vmatpush3.bf16.msra.mxu0 %v1602_v29 }
 0x3e7   : > { %1321 = vmatprep.subr.bf16.mxu0 %v1458_v20 }
 0x3ea   : > { %1323 = vmatpush3.bf16.msra.mxu0 %v1610_v30 }
 0x4a0   : > { %v446_v58 = vpop.f32.mrb[4].mxu0 }
 0x4a1   : > { %v451_v59 = vrot.slane %v446_v58, 4  ;;  %v1050_v60 = vpop.f32.mrb[5].mxu0 }
 0x4a3   : > { %v453_v61 = vadd.f32 %v451_v59, %v1638_v32 }
 0x4a5   : > { %1382 = vtanh.f32 %v453_v61 }
 0x4af   : > { %v1383_v62 = vpop.eup %1382 }
 0x4b0   : > { %v696_v63 = vsel %vm695_vm4, %v694_v56, %v1383_v62  ;;  %v456_v0 = vrot.slane %v1383_v62, 4 }
 0x4b2   : > { %1084 = vmatmul.mubr.f32.vlgmr.msra.gmra.mrb[4].mxu1 %v456_v0 }
 0x4b3   : > { %1326 = vmatpush3.bf16.msra.mxu1 %v1545_v19  ;;  %1153 = vmatprep.mubr.msk.f32.mxu1 %vm1459_vm0, %v1460_v22 }
 0x4b4   : > { %1327 = vmatprep.subr.bf16.mxu1 %v1458_v20 }
 0x4b7   : > { %1329 = vmatpush3.bf16.msra.mxu1 %v1551_v21 }
 0x4b8   : > { %1330 = vmatprep.subr.bf16.mxu1 %v1458_v20 }
 0x4bb   : > { %1332 = vmatpush3.bf16.msra.mxu1 %v1568_v25 }
 0x4bc   : > { %1333 = vmatprep.subr.bf16.mxu1 %v1458_v20 }
 0x4bf   : > { %1335 = vmatpush3.bf16.msra.mxu1 %v1578_v26 }
 0x4c0   : > { %1336 = vmatprep.subr.bf16.mxu1 %v1458_v20 }
 0x4c3   : > { %1338 = vmatpush3.bf16.msra.mxu1 %v1586_v27 }
 0x4c4   : > { %1339 = vmatprep.subr.bf16.mxu1 %v1458_v20 }
 0x4c7   : > { %1341 = vmatpush3.bf16.msra.mxu1 %v1594_v28 }
 0x4c8   : > { %1342 = vmatprep.subr.bf16.mxu1 %v1458_v20 }
 0x4cb   : > { %1344 = vmatpush3.bf16.msra.mxu1 %v1602_v29 }
 0x4cc   : > { %1345 = vmatprep.subr.bf16.mxu1 %v1458_v20 }
 0x4cf   : > { %1347 = vmatpush3.bf16.msra.mxu1 %v1610_v30 }
 0x585   : > { %v524_v18 = vpop.f32.mrb[4].mxu1 }
 0x586   : > { %v529_v19 = vrot.slane %v524_v18, 3  ;;  %v1085_v21 = vpop.f32.mrb[5].mxu1 }
 0x588   : > { %v531_v22 = vadd.f32 %v529_v19, %v1638_v32 }
 0x58a   : > { %1384 = vtanh.f32 %v531_v22 }
 0x594   : > { %v1385_v23 = vpop.eup %1384 }
 0x595   : > { %v698_v24 = vsel %vm697_vm5, %v696_v63, %v1385_v23  ;;  %v534_v25 = vrot.slane %v1385_v23, 5 }
 0x597   : > { %1119 = vmatmul.mubr.f32.vlgmr.msra.gmra.mrb[6].mxu0 %v534_v25 }
 0x66a   : > { %v602_v26 = vpop.f32.mrb[6].mxu0 }
 0x66b   : > { %v607_v27 = vrot.slane %v602_v26, 2  ;;  %v1120_v28 = vpop.f32.mrb[7].mxu0 }
 0x66d   : > { %v609_v29 = vadd.f32 %v607_v27, %v1638_v32 }
 0x66f   : > { %1386 = vtanh.f32 %v609_v29 }
 0x679   : > { %v1387_v20 = vpop.eup %1386 }
 0x67a   : > { %v700_v30 = vsel %vm699_vm6, %v698_v24, %v1387_v20  ;;  %v612_v31 = vrot.slane %v1387_v20, 6 }
 0x67c   : > { %1154 = vmatmul.mubr.f32.vlgmr.msra.gmra.mrb[6].mxu1 %v612_v31 }
 0x74f   : > { %v680_v33 = vpop.f32.mrb[6].mxu1 }
 0x750   : > { %v685_v34 = vrot.slane %v680_v33, 1  ;;  %v1155_v35 = vpop.f32.mrb[7].mxu1 }
 0x752   : > { %v687_v36 = vadd.f32 %v685_v34, %v1638_v32 }
 0x754   : > { %1388 = vtanh.f32 %v687_v36 }
 0x75b   :  { %56 = sbr.rel (!%p54_p8) target bundleno = 28 (0x1c), region = 49 }
 0x75e   : > { %v1389_v37 = vpop.eup %1388 }
 0x75f   : > { %v702_v38 = vsel %vm701_vm7, %v700_v30, %v1389_v37  ;;  %v706_v39 = vrot.slane %v1389_v37, 7  }
 0x760   : > { %704 = vst [vmem:[%s703_s4] sm:$0xff] %v702_v38 }
 0x761   : > { %v1762_v18 = vmov %v706_v39  ;;  %708 = vst [vmem:[#allocation2] sm:$0x1] (%p54_p8), %v706_v39 }
 0x762   :  { %1423 = shalt.err (!%p1420_p13)
}
 0x763   :  { %s1424_s10 = scalar_lea.hbm %s1761_s3, 256 }
 0x764   :  { %p1425_p0 = scmp.ne.s32.totalorder %s1761_s3, %s1424_s10  ;;  %p1428_p1 = scmp.lt.u32.totalorder %s1424_s10, %s1761_s3 }
 0x766   :  { %p1430_p2 = pnand %p1428_p1, %p1425_p0 }
 0x768   :  { %1433 = shalt.err (!%p1430_p2)
}
 0x769   :  { %720 = dma.vmem_to_hbm [thread:$0]  %s715_s6, 256, %s1761_s3, [#allocation5], %s1455_s22, %s1455_s22, %s1456_s23  }
 0x76a   :  { %1444 = dma.done.wait [#allocation5], 256  }
 0x76b   :  { %1445 = vsyncadd [#allocation5], 4294967040 }
 0x76c   :  { %724 = vsyncpa [#allocation4], 1 }
 0x76d   :  { %725 = vsyncpa [#allocation5], 1 }

</bundles_post_ra>
